<compile_context>
chip_gen: v5e
topology: v5e:2x2
jax: 0.10.0
libtpu: 0.0.40
codegen_flags: <defaults>
</compile_context>

<pallas_src>
import functools

import jax
import jax.numpy as jnp
from jax.experimental import pallas as pl
from jax.experimental.pallas import tpu as pltpu


def _round_up(x: int, m: int) -> int:
    return ((x + m - 1) // m) * m


def _cdiv(a: int, b: int) -> int:
    return -(-a // b)


def mlp_seq_kernel(x_ref, w1_ref, b1_ref, w2_ref, b2_ref, o_ref):
    """Fused Linear(d_in->d_hidden) -> ReLU -> Linear(d_hidden->d_out).

    x_ref:  (tile_b, d_in)      f32   (batch tile; cast to bf16 in-VMEM)
    w1_ref: (d_in, d_hidden)    bf16  (resident)
    b1_ref: (1, d_hidden)       f32   (resident)
    w2_ref: (d_hidden, d_out)   bf16  (resident)
    b2_ref: (1, d_out)          f32   (resident)
    o_ref:  (tile_b, d_out)     f32   (full-width last dim, contiguous HBM rows)
    """
    # --- block 1: nn.Linear(d_in, d_hidden) --- (bf16 MXU, f32 accumulate)
    x_bf = x_ref[...].astype(jnp.bfloat16)          # in-kernel cast (VPU)
    h = jnp.dot(x_bf, w1_ref[...], preferred_element_type=jnp.float32)
    # --- block 2: nn.ReLU() --- (f32 elementwise: bias add + relu)
    h = jnp.maximum(h + b1_ref[...], 0.0)
    # --- block 3: nn.Linear(d_hidden, d_out) --- (bf16 MXU, f32 accumulate)
    y = jnp.dot(h.astype(jnp.bfloat16), w2_ref[...],
                preferred_element_type=jnp.float32)
    o_ref[...] = (y + b2_ref[...]).astype(o_ref.dtype)


@functools.partial(jax.jit, static_argnames=("tile_b",))
def my_sequential(x, w1, b1, w2, b2, *, tile_b: int = 1024):
    """MySequential(Linear(d_in,d_hidden), ReLU, Linear(d_hidden,d_out))(x)."""
    batch, d_in = x.shape
    d_hidden = w1.shape[1]
    d_out = w2.shape[1]

    # Batch tiling: pick the number of tiles first to avoid pathological
    # padding, then align the tile to 16 rows (bf16 sublane pack).
    num_tiles = _cdiv(batch, tile_b)
    if batch > 16 and num_tiles < 2:
        num_tiles = 2                      # v7x: give both TensorCores work
    tile_b_eff = _round_up(_cdiv(batch, num_tiles), 16)
    batch_p = num_tiles * tile_b_eff

    # x stays f32 in HBM (cast happens inside the kernel). Zero-pad batch rows.
    x_f = x.astype(jnp.float32)
    if batch_p != batch:
        x_f = jnp.pad(x_f, ((0, batch_p - batch), (0, 0)))

    # MXU operands in bf16; elementwise operands (biases) in f32.
    w1_b = w1.astype(jnp.bfloat16)
    w2_b = w2.astype(jnp.bfloat16)
    b1_f = b1.astype(jnp.float32).reshape(1, d_hidden)
    b2_f = b2.astype(jnp.float32).reshape(1, d_out)

    grid = (num_tiles,)

    flops = 2 * batch_p * (d_in * d_hidden + d_hidden * d_out)
    bytes_accessed = (x_f.size * 4 + w1_b.size * 2 + b1_f.size * 4
                      + w2_b.size * 2 + b2_f.size * 4
                      + batch_p * d_out * 4)

    out = pl.pallas_call(
        mlp_seq_kernel,
        out_shape=jax.ShapeDtypeStruct((batch_p, d_out), jnp.float32),
        grid=grid,
        in_specs=[
            pl.BlockSpec((tile_b_eff, d_in), lambda i: (i, 0)),    # x tile (f32)
            pl.BlockSpec((d_in, d_hidden), lambda i: (0, 0)),      # w1 resident
            pl.BlockSpec((1, d_hidden), lambda i: (0, 0)),         # b1 resident
            pl.BlockSpec((d_hidden, d_out), lambda i: (0, 0)),     # w2 resident
            pl.BlockSpec((1, d_out), lambda i: (0, 0)),            # b2 resident
        ],
        # Full-width last dim (d_out == array last dim) -> legal narrow block,
        # contiguous per-row HBM writes, no lane padding, no column slice.
        out_specs=pl.BlockSpec((tile_b_eff, d_out), lambda i: (i, 0)),
        compiler_params=pltpu.CompilerParams(
            dimension_semantics=("parallel",),   # 2-TC sharding on v7x
        ),
        cost_estimate=pl.CostEstimate(
            flops=flops, transcendentals=0, bytes_accessed=bytes_accessed),
    )(x_f, w1_b, b1_f, w2_b, b2_f)

    # Drop batch padding only (no column padding anymore).
    return out if batch_p == batch else out[:batch]


def _reference_bf16(x, w1, b1, w2, b2):
    """Same math as the kernel (bf16 MXU operands, f32 accumulation)."""
    h = jnp.dot(x.astype(jnp.bfloat16), w1.astype(jnp.bfloat16),
                preferred_element_type=jnp.float32)
    h = jnp.maximum(h + b1.astype(jnp.float32), 0.0)
    y = jnp.dot(h.astype(jnp.bfloat16), w2.astype(jnp.bfloat16),
                preferred_element_type=jnp.float32)
    return y + b2.astype(jnp.float32)


def _reference_f32(x, w1, b1, w2, b2):
    h = jnp.maximum(x @ w1 + b1, 0.0)
    return h @ w2 + b2


if __name__ == "__main__":
    key = jax.random.PRNGKey(0)
    k_x, k_w1, k_b1, k_w2, k_b2 = jax.random.split(key, 5)

    batch, d_in, d_hidden, d_out = 2, 20, 256, 10

    x = jax.random.normal(k_x, (batch, d_in), dtype=jnp.float32)
    # Deterministic "PyTorch-like" uniform init, fixed by PRNGKey(0).
    bound1 = 1.0 / jnp.sqrt(d_in)
    w1 = jax.random.uniform(k_w1, (d_in, d_hidden), jnp.float32, -bound1, bound1)
    b1 = jax.random.uniform(k_b1, (1, d_hidden), jnp.float32, -bound1, bound1)
    bound2 = 1.0 / jnp.sqrt(d_hidden)
    w2 = jax.random.uniform(k_w2, (d_hidden, d_out), jnp.float32, -bound2, bound2)
    b2 = jax.random.uniform(k_b2, (1, d_out), jnp.float32, -bound2, bound2)

    out = my_sequential(x, w1, b1, w2, b2)
    out = jax.block_until_ready(out)
    assert out.shape == (batch, d_out), out.shape

    ref_b = _reference_bf16(x, w1, b1, w2, b2)
    assert jnp.allclose(out, ref_b, atol=1e-3, rtol=1e-3), "mismatch vs bf16 reference"

    ref_f = _reference_f32(x, w1, b1, w2, b2)
    assert jnp.allclose(out, ref_f, atol=5e-2, rtol=5e-2), "mismatch vs f32 reference"

    print("KERNEL_OK")
</pallas_src>

<mosaic_0001>
module attributes {stable_mosaic.version = 11 : i64} {
  func.func @mlp_seq_kernel(%arg0: i32, %arg1: memref<16x20xf32, #tpu.memory_space<vmem>>, %arg2: memref<20x256xbf16, #tpu.memory_space<vmem>>, %arg3: memref<1x256xf32, #tpu.memory_space<vmem>>, %arg4: memref<256x10xbf16, #tpu.memory_space<vmem>>, %arg5: memref<1x10xf32, #tpu.memory_space<vmem>>, %arg6: memref<16x10xf32, #tpu.memory_space<vmem>>) attributes {dimension_semantics = [#tpu.dimension_semantics<parallel>], iteration_bounds = array<i64: 1>, scalar_prefetch = 0 : i64, scratch_operands = 0 : i64, tpu.core_type = #tpu.core_type<tc>, window_params = [{transform_indices = @transform_0, window_bounds = array<i64: 16, 20>}, {pipeline_mode = #tpu.pipeline_mode<synchronous>, transform_indices = @transform_1, window_bounds = array<i64: 20, 256>}, {pipeline_mode = #tpu.pipeline_mode<synchronous>, transform_indices = @transform_2, window_bounds = array<i64: 1, 256>}, {pipeline_mode = #tpu.pipeline_mode<synchronous>, transform_indices = @transform_3, window_bounds = array<i64: 256, 10>}, {pipeline_mode = #tpu.pipeline_mode<synchronous>, transform_indices = @transform_4, window_bounds = array<i64: 1, 10>}, {transform_indices = @transform_5, window_bounds = array<i64: 16, 10>}]} {
    %c0 = arith.constant 0 : index
    %c0_0 = arith.constant 0 : index
    %0 = vector.load %arg1[%c0, %c0_0] : memref<16x20xf32, #tpu.memory_space<vmem>>, vector<16x20xf32>
    %1 = arith.truncf %0 : vector<16x20xf32> to vector<16x20xbf16>
    %c0_1 = arith.constant 0 : index
    %c0_2 = arith.constant 0 : index
    %2 = vector.load %arg2[%c0_1, %c0_2] : memref<20x256xbf16, #tpu.memory_space<vmem>>, vector<20x256xbf16>
    %cst = arith.constant dense<0.000000e+00> : vector<16x256xf32>
    %3 = tpu.matmul %1, %2, %cst {dimension_numbers = #tpu.dot_dimension_numbers<[1], [0], [0], [1], [0, 0, 1, 1], [], []>} : vector<16x20xbf16>, vector<20x256xbf16>, vector<16x256xf32> -> vector<16x256xf32>
    %c0_3 = arith.constant 0 : index
    %c0_4 = arith.constant 0 : index
    %4 = vector.load %arg3[%c0_3, %c0_4] : memref<1x256xf32, #tpu.memory_space<vmem>>, vector<1x256xf32>
    %5 = vector.broadcast %4 : vector<1x256xf32> to vector<16x256xf32>
    %6 = arith.addf %3, %5 : vector<16x256xf32>
    %cst_5 = arith.constant 0.000000e+00 : f32
    %7 = vector.broadcast %cst_5 : f32 to vector<16x256xf32>
    %8 = arith.maximumf %6, %7 : vector<16x256xf32>
    %9 = arith.truncf %8 : vector<16x256xf32> to vector<16x256xbf16>
    %c0_6 = arith.constant 0 : index
    %c0_7 = arith.constant 0 : index
    %10 = vector.load %arg4[%c0_6, %c0_7] : memref<256x10xbf16, #tpu.memory_space<vmem>>, vector<256x10xbf16>
    %cst_8 = arith.constant dense<0.000000e+00> : vector<16x10xf32>
    %11 = tpu.matmul %9, %10, %cst_8 {dimension_numbers = #tpu.dot_dimension_numbers<[1], [0], [0], [1], [0, 0, 1, 1], [], []>} : vector<16x256xbf16>, vector<256x10xbf16>, vector<16x10xf32> -> vector<16x10xf32>
    %c0_9 = arith.constant 0 : index
    %c0_10 = arith.constant 0 : index
    %12 = vector.load %arg5[%c0_9, %c0_10] : memref<1x10xf32, #tpu.memory_space<vmem>>, vector<1x10xf32>
    %13 = vector.broadcast %12 : vector<1x10xf32> to vector<16x10xf32>
    %14 = arith.addf %11, %13 : vector<16x10xf32>
    %c0_11 = arith.constant 0 : index
    %c0_12 = arith.constant 0 : index
    %15 = vector.load %arg6[%c0_11, %c0_12] : memref<16x10xf32, #tpu.memory_space<vmem>>, vector<16x10xf32>
    tpu.vector_store %arg6[%c0_11, %c0_12], %14 {strides = array<i32>} : memref<16x10xf32, #tpu.memory_space<vmem>>, vector<16x10xf32>,
    return
  }
  func.func @transform_0(%arg0: i32) -> (i32, i32) {
    %c0_i32 = arith.constant 0 : i32
    %c0_i32_0 = arith.constant 0 : i32
    return %arg0, %c0_i32 : i32, i32
  }
  func.func @transform_1(%arg0: i32) -> (i32, i32) {
    %c0_i32 = arith.constant 0 : i32
    %c0_i32_0 = arith.constant 0 : i32
    %c0_i32_1 = arith.constant 0 : i32
    return %c0_i32, %c0_i32_0 : i32, i32
  }
  func.func @transform_2(%arg0: i32) -> (i32, i32) {
    %c0_i32 = arith.constant 0 : i32
    %c0_i32_0 = arith.constant 0 : i32
    %c0_i32_1 = arith.constant 0 : i32
    return %c0_i32, %c0_i32_0 : i32, i32
  }
  func.func @transform_3(%arg0: i32) -> (i32, i32) {
    %c0_i32 = arith.constant 0 : i32
    %c0_i32_0 = arith.constant 0 : i32
    %c0_i32_1 = arith.constant 0 : i32
    return %c0_i32, %c0_i32_0 : i32, i32
  }
  func.func @transform_4(%arg0: i32) -> (i32, i32) {
    %c0_i32 = arith.constant 0 : i32
    %c0_i32_0 = arith.constant 0 : i32
    %c0_i32_1 = arith.constant 0 : i32
    return %c0_i32, %c0_i32_0 : i32, i32
  }
  func.func @transform_5(%arg0: i32) -> (i32, i32) {
    %c0_i32 = arith.constant 0 : i32
    %c0_i32_0 = arith.constant 0 : i32
    return %arg0, %c0_i32 : i32, i32
  }
}

</mosaic_0001>

<bundles_post_ra>
// kernel: my_sequential.1
= control target key start
LH: loop header
LB: loop body
LE: loop exit
PB: predicated region body
PF: predicated region fallthrough
CT: control target
= control target key end

     0   :  { %vm52_vm0 = vcmask 1041408   ;;  %vm48_vm1 = vcmask 162816   ;;  %vm253_vm2 = vcmask 80896   ;;  %s464_s1 = inlined_call_operand.vmem [shape: bf16[20,256], index: 1, kind: input, shape index: {}]   ;;  %s465_s3 = inlined_call_operand.vmem [shape: bf16[256,10], index: 3, kind: input, shape index: {}]   ;;  %s466_s0 = inlined_call_operand.vmem [shape: f32[16,20], index: 0, kind: input, shape index: {}]   ;;  %s467_s4 = inlined_call_operand.vmem [shape: f32[1,10], index: 4, kind: input, shape index: {}]   ;;  %s468_s2 = inlined_call_operand.vmem [shape: f32[1,256], index: 2, kind: input, shape index: {}]   ;;  %s469_s5 = inlined_call_operand.vmem [shape: f32[16,10], index: 5, kind: output, shape index: {}]  }
   0x1   :  { %v26_v0 = vld [vmem:[%s464_s1 + $0x10] sm:$0x33]  ;;  %v262_v3 = vld [vmem:[%s464_s1] sm:$0xf]  ;;  %v343_v4 = vld [vmem:[%s465_s3 + $0x38] sm:$0xff] }
   0x2   :  { %v40_v1 = vunpack.c.l.b16 %v26_v0  ;;  %v41_v2 = vunpack.c.h.b16 %v26_v0  ;;  %v351_v5 = vld [vmem:[%s465_s3 + $0x78] sm:$0xff]  ;;  %v335_v8 = vld [vmem:[%s464_s1 + $0x4] sm:$0xf0]  ;;  %v334_v9 = vld [vmem:[%s464_s1 + $0x4] sm:$0xf]  ;;  %225 = vmatpush.bf16.msra.mxu2 %v343_v4 }
   0x3   :  { %v264_v10 = vld [vmem:[%s464_s1 + $0x8] sm:$0xf0]  ;;  %239 = vmatpush.bf16.msra.mxu3 %v351_v5  ;;  %v342_v11 = vld [vmem:[%s465_s3 + $0x30] sm:$0xff]  ;;  %v263_v15 = vor.u32 %v335_v8, %v262_v3  ;;  %v21_v17 = vld [vmem:[%s466_s0] sm:$0xff] }
   0x4   :  { %v44_v6 = vpack.c.b16 %v40_v1, %v40_v1  ;;  %v45_v7 = vpack.c.b16 %v41_v2, %v41_v2  ;;  %v350_v12 = vld [vmem:[%s465_s3 + $0x70] sm:$0xff]  ;;  %v267_v16 = vor.u32 %v334_v9, %v264_v10  ;;  %v22_v18 = vld [vmem:[%s466_s0 + $0x8] sm:$0xff]  ;;  %v340_v22 = vld [vmem:[%s465_s3 + $0x20] sm:$0xff] }
   0x5   :  { %v341_v19 = vld [vmem:[%s465_s3 + $0x28] sm:$0xff]  ;;  %v23_v21 = vpack.c.bf16 %v22_v18, %v21_v17  ;;  %v348_v23 = vld [vmem:[%s465_s3 + $0x60] sm:$0xff]  ;;  %v339_v24 = vld [vmem:[%s465_s3 + $0x18] sm:$0xff] }
   0x6   :  { %v54_v13 = vsel %vm52_vm0, %v44_v6, 0  ;;  %v57_v14 = vsel %vm52_vm0, %v45_v7, 0  ;;  %226 = vmatpush.bf16.msra.mxu2 %v342_v11  ;;  %v349_v20 = vld [vmem:[%s465_s3 + $0x68] sm:$0xff]  ;;  %v347_v25 = vld [vmem:[%s465_s3 + $0x58] sm:$0xff]  ;;  %v338_v26 = vld [vmem:[%s465_s3 + $0x10] sm:$0xff] }
   0x7   :  { %65 = vmatpush.bf16.msra.mxu0 %v54_v13  ;;  %79 = vmatpush.bf16.msra.mxu1 %v57_v14  ;;  %v346_v27 = vld [vmem:[%s465_s3 + $0x50] sm:$0xff]  ;;  %v337_v28 = vld [vmem:[%s465_s3 + $0x8] sm:$0xff]  ;;  %v336_v30 = vld [vmem:[%s465_s3] sm:$0xff] }
   0x8   :  { %240 = vmatpush.bf16.msra.mxu3 %v350_v12  ;;  %v345_v29 = vld [vmem:[%s465_s3 + $0x48] sm:$0xff]  ;;  %v344_v31 = vld [vmem:[%s465_s3 + $0x40] sm:$0xff] }
   0x9   :  { %v27_v32 = vld [vmem:[%s468_s2] sm:$0x3] }
   0xa   :  { %227 = vmatpush.bf16.msra.mxu2 %v341_v19  ;;  %v29_v35 = vperm.slane %v27_v32, 0  ;;  %v30_v36 = vperm.slane %v27_v32, 1  ;;  %v352_v49 = vld [vmem:[%s467_s4] ss:$0 sm:$0xff] }
   0xb   :  { %66 = vmatpush.bf16.msra.mxu0 %v263_v15  ;;  %80 = vmatpush.bf16.msra.mxu1 %v267_v16 }
   0xc   :  { %241 = vmatpush.bf16.msra.mxu3 %v349_v20 }
   0xe   :  { %268 = vmatmul.msk.bf16.vlgmr.msra.gmra.mxu0 %vm48_vm1, %v23_v21  ;;  %269 = vmatmul.msk.bf16.vlgmr.msra.gmra.mxu1 %vm48_vm1, %v23_v21 }
   0xf   :  { %228 = vmatpush.bf16.msra.mxu2 %v340_v22 }
  0x10   :  { %242 = vmatpush.bf16.msra.mxu3 %v348_v23 }
  0x13   :  { %229 = vmatpush.bf16.msra.mxu2 %v339_v24 }
  0x14   :  { %243 = vmatpush.bf16.msra.mxu3 %v347_v25 }
  0x17   :  { %230 = vmatpush.bf16.msra.mxu2 %v338_v26 }
  0x18   :  { %244 = vmatpush.bf16.msra.mxu3 %v346_v27 }
  0x1b   :  { %231 = vmatpush.bf16.msra.mxu2 %v337_v28 }
  0x1c   :  { %245 = vmatpush.bf16.msra.mxu3 %v345_v29 }
  0x1f   :  { %232 = vmatpush.bf16.msra.mxu2 %v336_v30 }
  0x20   :  { %246 = vmatpush.bf16.msra.mxu3 %v344_v31 }
  0x8b   :  { %v68_v33 = vpop.f32.mrf.mxu0  ;;  %v82_v34 = vpop.f32.mrf.mxu1 }
  0x8c   :  { %v69_v37 = vadd.f32 %v68_v33, %v29_v35  ;;  %v83_v38 = vadd.f32 %v82_v34, %v30_v36 }
  0x8e   :  { %v87_v43 = vmax.f32 %v69_v37, 0.0  ;;  %v88_v44 = vmax.f32 %v83_v38, 0.0 }
  0x93   :  { %v70_v39 = vpop.f32.mrf.mxu0  ;;  %v84_v40 = vpop.f32.mrf.mxu1 }
  0x94   :  { %v71_v41 = vadd.f32 %v70_v39, %v29_v35  ;;  %v85_v42 = vadd.f32 %v84_v40, %v30_v36 }
  0x96   :  { %v89_v45 = vmax.f32 %v71_v41, 0.0  ;;  %v90_v46 = vmax.f32 %v85_v42, 0.0 }
  0x98   :  { %v91_v47 = vpack.c.bf16 %v89_v45, %v87_v43  ;;  %v92_v48 = vpack.c.bf16 %v90_v46, %v88_v44 }
  0x9a   :  { %233 = vmatmul.bf16.vlgmr.msra.gmra.mxu2 %v91_v47  ;;  %247 = vmatmul.bf16.vlgmr.msra.gmra.mxu3 %v92_v48 }
 0x11d   :  { %v234_v50 = vpop.f32.mrf.mxu2  ;;  %v248_v51 = vpop.f32.mrf.mxu3 }
 0x11e   :  { %v235_v52 = vadd.f32 %v352_v49, %v234_v50 }
 0x120   :  { %v249_v53 = vadd.f32 %v248_v51, %v235_v52 }
 0x122   :  { %254 = vst.msk [vmem:[%s469_s5] sm:$0xff] %vm253_vm2, %v249_v53 }
 0x125   :  { %v236_v54 = vpop.f32.mrf.mxu2  ;;  %v250_v56 = vpop.f32.mrf.mxu3 }
 0x126   :  { %v237_v55 = vadd.f32 %v352_v49, %v236_v54 }
 0x128   :  { %v251_v57 = vadd.f32 %v250_v56, %v237_v55 }
 0x12a   :  { %255 = vst.msk [vmem:[%s469_s5 + $0x8] sm:$0xff] %vm253_vm2, %v251_v57 }

</bundles_post_ra>
